<compile_context>
chip_gen: v7x
topology: tpu7x:2x2x1
jax: 0.10.0
libtpu: 0.0.40
codegen_flags: <defaults>
</compile_context>

<pallas_src>
import functools

import jax
import jax.numpy as jnp
from jax.experimental import pallas as pl
from jax.experimental.pallas import tpu as pltpu

_LANE = 128
_SUBLANE = 8


def _round_up(x, m):
    return ((x + m - 1) // m) * m


def _dense_ce_kernel(logits_ref, labels_ref, out_ref, *, n_rows, tile_rows):
    i = pl.program_id(0)

    logits = logits_ref[...].astype(jnp.float32)   # (TN, C)
    labels = labels_ref[...].astype(jnp.float32)   # (TN, C)

    # loss_row = sum(labels) * logsumexp(logits) - sum(labels * logits)
    m = jnp.max(logits, axis=-1, keepdims=True)                    # (TN, 1)
    sumexp = jnp.sum(jnp.exp(logits - m), axis=-1, keepdims=True)  # (TN, 1)
    lse = m + jnp.log(sumexp)                                      # (TN, 1)
    wsum = jnp.sum(labels, axis=-1, keepdims=True)                 # (TN, 1)
    wlogit = jnp.sum(labels * logits, axis=-1, keepdims=True)      # (TN, 1)
    loss_row = wsum * lse - wlogit                                 # (TN, 1)

    # Rows of the last (partial) tile beyond the true batch hold undefined
    # data; mask them out before the tile reduction.
    row_ids = i * tile_rows + jax.lax.broadcasted_iota(
        jnp.int32, loss_row.shape, 0)
    loss_row = jnp.where(row_ids < n_rows, loss_row, 0.0)

    partial = jnp.sum(loss_row).astype(jnp.float32)
    # Broadcast the scalar partial into this tile's lane-dense output block
    # (unmasked vector store); wrapper reads element [:, 0, 0].
    out_ref[...] = jnp.broadcast_to(partial, out_ref.shape)


def dense_cross_entropy(logits, labels, *, tile_rows=None,
                        target_tile_bytes=2 * 1024 * 1024):
    """Pallas equivalent of DenseCrossEntropy.forward(logits, labels)."""
    assert logits.shape == labels.shape and logits.ndim == 2
    n, c = logits.shape

    # VMEM tiles are lane-padded to 128 regardless of C; budget with that.
    c_lanes = _round_up(max(c, 1), _LANE)

    if tile_rows is None:
        itemsize = max(jnp.dtype(logits.dtype).itemsize,
                       jnp.dtype(labels.dtype).itemsize)
        rows_budget = max(
            _SUBLANE,
            (target_tile_bytes // (c_lanes * itemsize)) // _SUBLANE * _SUBLANE)
        tile_rows = int(min(_round_up(n, _SUBLANE), rows_budget))
    tile_rows = max(_SUBLANE, _round_up(int(tile_rows), _SUBLANE))

    grid = pl.cdiv(n, tile_rows)

    partials = pl.pallas_call(
        functools.partial(_dense_ce_kernel, n_rows=n, tile_rows=tile_rows),
        out_shape=jax.ShapeDtypeStruct((grid, _SUBLANE, _LANE), jnp.float32),
        grid=(grid,),
        in_specs=[
            # Class dim is a full-extent block: no 128-padding copy in HBM.
            pl.BlockSpec((tile_rows, c), lambda i: (i, 0)),
            pl.BlockSpec((tile_rows, c), lambda i: (i, 0)),
        ],
        out_specs=pl.BlockSpec((1, _SUBLANE, _LANE), lambda i: (i, 0, 0)),
        compiler_params=pltpu.CompilerParams(
            dimension_semantics=("parallel",),
            vmem_limit_bytes=32 * 1024 * 1024,
        ),
    )(logits, labels)

    # Tiny final reduction over per-tile partial sums; mean over the true N.
    return jnp.sum(partials[:, 0, 0]) / n


if __name__ == "__main__":
    key = jax.random.PRNGKey(0)
    k1, k2, k3, k4, k5, k6 = jax.random.split(key, 6)

    def ref_loss(lg, lb):
        lp = jax.nn.log_softmax(lg.astype(jnp.float32), axis=-1)
        return jnp.mean(jnp.sum(-lb.astype(jnp.float32) * lp, axis=-1))

    # Case 1: aligned shapes (batch=8, classes=128), single tile.
    n1, c1 = 8, 128
    logits1 = jax.random.normal(k1, (n1, c1), dtype=jnp.float32)
    labels1 = jax.nn.softmax(jax.random.normal(k2, (n1, c1)), axis=-1)
    out1 = dense_cross_entropy(logits1, labels1)
    jax.block_until_ready(out1)
    assert jnp.allclose(out1, ref_loss(logits1, labels1),
                        rtol=1e-5, atol=1e-5), (out1, ref_loss(logits1, labels1))

    # Case 2: plant-pathology-like shapes (batch=20, classes=4) — exercises
    # the non-128 class dim without padding, plus remainder-row masking.
    n2, c2 = 20, 4
    logits2 = jax.random.normal(k3, (n2, c2), dtype=jnp.float32)
    labels2 = jax.nn.softmax(jax.random.normal(k4, (n2, c2)), axis=-1)
    out2 = dense_cross_entropy(logits2, labels2)
    jax.block_until_ready(out2)
    assert jnp.allclose(out2, ref_loss(logits2, labels2),
                        rtol=1e-5, atol=1e-5), (out2, ref_loss(logits2, labels2))

    # Case 3: ragged classes (batch=20, classes=37), forced small tile —
    # multi-tile grid, partial final tile, bf16 logits upcast in-kernel.
    n3, c3 = 20, 37
    logits3 = jax.random.normal(k5, (n3, c3), dtype=jnp.float32).astype(jnp.bfloat16)
    labels3 = jax.nn.softmax(jax.random.normal(k6, (n3, c3)), axis=-1)
    out3 = dense_cross_entropy(logits3, labels3, tile_rows=8)
    jax.block_until_ready(out3)
    assert jnp.allclose(out3, ref_loss(logits3, labels3),
                        rtol=1e-4, atol=1e-4), (out3, ref_loss(logits3, labels3))

    print("KERNEL_OK")
</pallas_src>

<mosaic_0001>
module attributes {stable_mosaic.version = 11 : i64} {
  func.func @_dense_ce_kernel(%arg0: i32, %arg1: memref<8x128xf32, #tpu.memory_space<vmem>>, %arg2: memref<8x128xf32, #tpu.memory_space<vmem>>, %arg3: memref<1x8x128xf32, #tpu.memory_space<vmem>>) attributes {dimension_semantics = [#tpu.dimension_semantics<parallel>], iteration_bounds = array<i64: 1>, scalar_prefetch = 0 : i64, scratch_operands = 0 : i64, tpu.core_type = #tpu.core_type<tc>, window_params = [{transform_indices = @transform_0, window_bounds = array<i64: 8, 128>}, {transform_indices = @transform_1, window_bounds = array<i64: 8, 128>}, {transform_indices = @transform_2, window_bounds = array<i64: 1, 8, 128>}]} {
    %c0 = arith.constant 0 : index
    %c0_0 = arith.constant 0 : index
    %0 = vector.load %arg1[%c0, %c0_0] : memref<8x128xf32, #tpu.memory_space<vmem>>, vector<8x128xf32>
    %c0_1 = arith.constant 0 : index
    %c0_2 = arith.constant 0 : index
    %1 = vector.load %arg2[%c0_1, %c0_2] : memref<8x128xf32, #tpu.memory_space<vmem>>, vector<8x128xf32>
    %cst = arith.constant dense<0xFF800000> : vector<8xf32>
    %2 = vector.multi_reduction <maximumf>, %0, %cst [1] : vector<8x128xf32> to vector<8xf32>
    %3 = vector.shape_cast %2 : vector<8xf32> to vector<8x1xf32>
    %4 = vector.broadcast %3 : vector<8x1xf32> to vector<8x128xf32>
    %5 = arith.subf %0, %4 : vector<8x128xf32>
    %6 = math.exp %5 : vector<8x128xf32>
    %cst_3 = arith.constant dense<0.000000e+00> : vector<8xf32>
    %7 = vector.multi_reduction <add>, %6, %cst_3 [1] : vector<8x128xf32> to vector<8xf32>
    %8 = vector.shape_cast %7 : vector<8xf32> to vector<8x1xf32>
    %9 = math.log %8 : vector<8x1xf32>
    %10 = arith.addf %3, %9 : vector<8x1xf32>
    %cst_4 = arith.constant dense<0.000000e+00> : vector<8xf32>
    %11 = vector.multi_reduction <add>, %1, %cst_4 [1] : vector<8x128xf32> to vector<8xf32>
    %12 = vector.shape_cast %11 : vector<8xf32> to vector<8x1xf32>
    %13 = arith.mulf %1, %0 : vector<8x128xf32>
    %cst_5 = arith.constant dense<0.000000e+00> : vector<8xf32>
    %14 = vector.multi_reduction <add>, %13, %cst_5 [1] : vector<8x128xf32> to vector<8xf32>
    %15 = vector.shape_cast %14 : vector<8xf32> to vector<8x1xf32>
    %16 = arith.mulf %12, %10 : vector<8x1xf32>
    %17 = arith.subf %16, %15 : vector<8x1xf32>
    %c8_i32 = arith.constant 8 : i32
    %18 = arith.muli %arg0, %c8_i32 : i32
    %19 = tpu.iota {dimensions = array<i32: 0>} : vector<8x1xi32>
    %20 = vector.broadcast %18 : i32 to vector<8x1xi32>
    %21 = arith.addi %20, %19 : vector<8x1xi32>
    %c8_i32_6 = arith.constant 8 : i32
    %22 = vector.broadcast %c8_i32_6 : i32 to vector<8x1xi32>
    %23 = arith.cmpi slt, %21, %22 : vector<8x1xi32>
    %cst_7 = arith.constant 0.000000e+00 : f32
    %24 = vector.broadcast %cst_7 : f32 to vector<8x1xf32>
    %25 = arith.select %23, %17, %24 : vector<8x1xi1>, vector<8x1xf32>
    %26 = vector.shape_cast %25 : vector<8x1xf32> to vector<1x8x1xf32>
    %cst_8 = arith.constant dense<0.000000e+00> : vector<1xf32>
    %27 = vector.multi_reduction <add>, %26, %cst_8 [1, 2] : vector<1x8x1xf32> to vector<1xf32>
    %28 = vector.shape_cast %27 : vector<1xf32> to vector<1x1x1xf32>
    %29 = vector.extract %28[0, 0, 0] : f32 from vector<1x1x1xf32>
    %30 = vector.broadcast %29 : f32 to vector<1x8x128xf32>
    %c0_9 = arith.constant 0 : index
    %c0_10 = arith.constant 0 : index
    %c0_11 = arith.constant 0 : index
    %31 = vector.load %arg3[%c0_9, %c0_10, %c0_11] : memref<1x8x128xf32, #tpu.memory_space<vmem>>, vector<1x8x128xf32>
    tpu.vector_store %arg3[%c0_9, %c0_10, %c0_11], %30 {strides = array<i32>} : memref<1x8x128xf32, #tpu.memory_space<vmem>>, vector<1x8x128xf32>,
    return
  }
  func.func @transform_0(%arg0: i32) -> (i32, i32) {
    %c0_i32 = arith.constant 0 : i32
    %c0_i32_0 = arith.constant 0 : i32
    return %arg0, %c0_i32 : i32, i32
  }
  func.func @transform_1(%arg0: i32) -> (i32, i32) {
    %c0_i32 = arith.constant 0 : i32
    %c0_i32_0 = arith.constant 0 : i32
    return %arg0, %c0_i32 : i32, i32
  }
  func.func @transform_2(%arg0: i32) -> (i32, i32, i32) {
    %c0_i32 = arith.constant 0 : i32
    %c0_i32_0 = arith.constant 0 : i32
    %c0_i32_1 = arith.constant 0 : i32
    return %arg0, %c0_i32, %c0_i32_0 : i32, i32, i32
  }
}

</mosaic_0001>

<bundles_post_ra>
// kernel: tpu_custom_call.1
= control target key start
LH: loop header
LB: loop body
LE: loop exit
PB: predicated region body
PF: predicated region fallthrough
CT: control target
= control target key end

     0   :  { %7 = vsyncpa [#allocation3], 0  ;;  %s226_s0 = inlined_call_operand.hbm [shape: f32[8,128], index: 0, kind: input, shape index: {}]   ;;  %s227_s1 = inlined_call_operand.hbm [shape: f32[8,128], index: 1, kind: input, shape index: {}]   ;;  %s228_s2 = inlined_call_operand.hbm [shape: f32[1,8,128], index: 2, kind: output, shape index: {}]  }
   0x1   :  { %8 = vsyncpa [#allocation6], 0 }
   0x2   :  { %9 = vsyncpa [#allocation4], 0  ;;  %s172_s9 = smov [#allocation2]   ;;  %s173_s11 = smov [#allocation5]  }
   0x3   :  { %s16_s10 = sshll.u32 %s172_s9, 4  ;;  %s26_s12 = sshll.u32 %s173_s11, 4  ;;  %s17_s10 = int_to_ptr.vmem [resolvable:$true] %s16_s10  ;;  %s27_s12 = int_to_ptr.vmem [resolvable:$true] %s26_s12 }
   0x4   :  { %s100_s15 = scalar_lea.hbm %s226_s0, 128 }
   0x5   :  { %p101_p0 = scmp.ne.s32.totalorder %s226_s0, %s100_s15  ;;  %p104_p1 = scmp.lt.u32.totalorder %s100_s15, %s226_s0 }
   0x7   :  { %p106_p2 = pnand %p104_p1, %p101_p0 }
   0x9   :  { %109 = shalt.err (!%p106_p2)
}
   0xa   :  { %s110_s20 = scalar_lea.vmem %s17_s10, 128  ;;  %p115_p4 = scmp.lt.s32.totalorder %s17_s10, %s17_s10 }
   0xb   :  { %p111_p3 = scmp.ne.s32.totalorder %s17_s10, %s110_s20  ;;  %p116_p5 = scmp.lt.s32.totalorder %s110_s20, %s110_s20 }
   0xd   :  { %p117_p6 = por %p116_p5, %p115_p4 }
   0xf   :  { %p118_p7 = pnand %p117_p6, %p111_p3 }
  0x11   :  { %121 = shalt.err (!%p118_p7)
}
  0x12   :  { %19 = dma.hbm_to_vmem [thread:$0]  %s226_s0, 128, %s17_s10, [#allocation3]  }
  0x13   :  { %s122_s25 = scalar_lea.hbm %s227_s1, 128 }
  0x14   :  { %p123_p8 = scmp.ne.s32.totalorder %s227_s1, %s122_s25  ;;  %p126_p9 = scmp.lt.u32.totalorder %s122_s25, %s227_s1 }
  0x16   :  { %p128_p10 = pnand %p126_p9, %p123_p8 }
  0x18   :  { %131 = shalt.err (!%p128_p10)
}
  0x19   :  { %s132_s30 = scalar_lea.vmem %s27_s12, 128  ;;  %p137_p12 = scmp.lt.s32.totalorder %s27_s12, %s27_s12 }
  0x1a   :  { %p133_p11 = scmp.ne.s32.totalorder %s27_s12, %s132_s30  ;;  %p138_p13 = scmp.lt.s32.totalorder %s132_s30, %s132_s30 }
  0x1c   :  { %p139_p0 = por %p138_p13, %p137_p12 }
  0x1e   :  { %p140_p1 = pnand %p139_p0, %p133_p11 }
  0x20   :  { %143 = shalt.err (!%p140_p1)
}
  0x21   :  { %29 = dma.hbm_to_vmem [thread:$0]  %s227_s1, 128, %s27_s12, [#allocation6]  }
  0x22   :  { %166 = dma.done.wait [#allocation3], 128  }
  0x23   :  { %167 = vsyncadd [#allocation3], 4294967168 }
  0x24   :  { %168 = dma.done.wait [#allocation6], 128  }
  0x25   :  { %169 = vsyncadd [#allocation6], 4294967168  ;;  %v36_v0 = vld [vmem:[#allocation2] sm:$0xff]  ;;  %v37_v1 = vld [vmem:[#allocation5] sm:$0xff]  ;;  %vm62_vm0 = vcmask 7168   ;;  %s174_s1 = smov [#allocation7]  }
  0x26   :  { %38 = vmax.xlane.f32.xlu0 %v36_v0  ;;  %48 = vadd.xlane.f32.xlu1 %v37_v1  ;;  %v50_v2 = vmul.f32 %v37_v1, %v36_v0  ;;  %s81_s4 = sshll.u32 %s174_s1, 4  ;;  %s82_s4 = int_to_ptr.vmem [resolvable:$true] %s81_s4 }
  0x27   :  { %s144_s6 = scalar_lea.vmem %s82_s4, 128  ;;  %p149_p3 = scmp.lt.s32.totalorder %s82_s4, %s82_s4 }
  0x28   :  { %p145_p2 = scmp.ne.s32.totalorder %s82_s4, %s144_s6  ;;  %p150_p4 = scmp.lt.s32.totalorder %s144_s6, %s144_s6 }
  0x2a   :  { %51 = vadd.xlane.f32.xlu1 %v50_v2  ;;  %p151_p5 = por %p150_p4, %p149_p3 }
  0x2c   :  { %p152_p6 = pnand %p151_p5, %p145_p2 }
  0xb3   :  { %v39_v3 = vpop.xlane.xlu0 %38  ;;  %v49_v8 = vpop.xlane.xlu1 %48 }
  0xb4   :  { %v40_v4 = vsub.f32 %v36_v0, %v39_v3 }
  0xb6   :  { %v41_v5 = vmul.f32 1.442695, %v40_v4 }
  0xb7   :  { %v52_v12 = vpop.xlane.xlu1 %51 }
  0xb8   :  { %96 = vpow2.f32 %v41_v5 }
  0xc2   :  { %v97_v6 = vpop.eup %96 }
  0xc3   :  { %43 = vadd.xlane.f32.xlu0 %v97_v6 }
 0x150   :  { %v44_v7 = vpop.xlane.xlu0 %43 }
 0x151   :  { %98 = vlog2.f32 %v44_v7 }
 0x15b   :  { %v99_v9 = vpop.eup %98 }
 0x15c   :  { %v46_v10 = vmul.f32 0.6931472, %v99_v9 }
 0x15e   :  { %v47_v11 = vadd.f32 %v46_v10, %v39_v3 }
 0x160   :  { %v53_v13 = vmul.f32 %v49_v8, %v47_v11 }
 0x162   :  { %v54_v14 = vsub.f32 %v53_v13, %v52_v12 }
 0x164   :  { %v63_v15 = vsel %vm62_vm0, %v54_v14, 0.0 }
 0x165   :  { %64 = vadd.xlane.f32.xlu0 %v63_v15 }
 0x1f2   :  { %v65_v16 = vpop.xlane.xlu0 %64 }
 0x1f3   :  { %v66_v17 = vrot.slane %v65_v16, 4 }
 0x1f5   :  { %v67_v18 = vadd.f32 %v66_v17, %v65_v16 }
 0x1f7   :  { %v68_v19 = vrot.slane %v67_v18, 2 }
 0x1f9   :  { %v69_v20 = vadd.f32 %v68_v19, %v67_v18 }
 0x1fb   :  { %v70_v21 = vrot.slane %v69_v20, 1 }
 0x1fd   :  { %v71_v22 = vadd.f32 %v70_v21, %v69_v20 }
 0x1ff   :  { %91 = vpush %v71_v22 }
 0x230   :  { %s92_s5 = spop %91 }
 0x231   :  { %v73_v23 = vstv %s92_s5 }
 0x232   :  { %74 = vst [vmem:[#allocation7] sm:$0xff] %v73_v23 }
 0x233   :  { %155 = shalt.err (!%p152_p6)
}
 0x234   :  { %s156_s9 = scalar_lea.hbm %s228_s2, 128 }
 0x235   :  { %p157_p7 = scmp.ne.s32.totalorder %s228_s2, %s156_s9  ;;  %p160_p8 = scmp.lt.u32.totalorder %s156_s9, %s228_s2 }
 0x237   :  { %p162_p9 = pnand %p160_p8, %p157_p7 }
 0x239   :  { %165 = shalt.err (!%p162_p9)
}
 0x23a   :  { %84 = dma.vmem_to_hbm [thread:$0]  %s82_s4, 128, %s228_s2, [#allocation4]  }
 0x23b   :  { %170 = dma.done.wait [#allocation4], 128  }
 0x23c   :  { %171 = vsyncadd [#allocation4], 4294967168 }
 0x23d   :  { %88 = vsyncpa [#allocation3], 1 }
 0x23e   :  { %89 = vsyncpa [#allocation6], 1 }
 0x23f   :  { %90 = vsyncpa [#allocation4], 1 }

</bundles_post_ra>
